<compile_context>
chip_gen: v6e
topology: v6e:2x2x1
jax: 0.10.0
libtpu: 0.0.40
codegen_flags: <defaults>
</compile_context>

<pallas_src>
import math
from functools import partial

import jax
import jax.numpy as jnp
from jax.experimental import pallas as pl
from jax.experimental.pallas import tpu as pltpu

_EPS = 1e-8
_NUM_CLASSES = 10
_OUT_PAD = 128            # packed output slab width: lanes [0:10]=classifier, [10:10+L]=FF logits
_VMEM_BUDGET = 24 << 20   # working budget for the row-tile picker (headroom under v7x's 32 MiB scoped)
_EXACT_PARITY = False     # True -> exact divide + f32 matmuls (strict parity with torch)
_MATMUL_DTYPE = jnp.float32 if _EXACT_PARITY else jnp.bfloat16


def _round_up(x, m):
    return ((x + m - 1) // m) * m


def _inv_rms(mean_sq):
    # torch _layer_norm: z / (sqrt(mean(z**2, -1, keepdim=True)) + 1e-8)
    rms = jnp.sqrt(mean_sq)
    if _EXACT_PARITY:
        return 1.0 / (rms + _EPS)
    return pl.reciprocal(rms + _EPS, approx=True)    # EUP slot -> nearly free


# ---------------------------------------------------------------------------
# Fused per-frame Pallas kernel
# ---------------------------------------------------------------------------
def _make_fused_kernel(num_layers, true_hidden):
    """One kernel per frame: all FF layers + downstream classifier; z never leaves VMEM."""
    d_true = float(true_hidden)   # true (unpadded) hidden width: ssq offset + norm divisor

    def kernel(*refs):
        z_ref = refs[0]
        layer_refs = refs[1:1 + 2 * num_layers]           # w0, b0, w1, b1, ...
        cls_w_ref = refs[1 + 2 * num_layers]
        cls_b_ref = refs[2 + 2 * num_layers]
        out_ref = refs[3 + 2 * num_layers]

        tile_n = z_ref.shape[0]
        z = z_ref[...].astype(jnp.float32)
        # stats for the initial _layer_norm (divisor = true input feature count)
        mean_sq = jnp.mean(z * z, axis=-1, keepdims=True)

        logit_cols = []
        for l in range(num_layers):
            w = layer_refs[2 * l][...]
            b = layer_refs[2 * l + 1][...]
            zn = z * _inv_rms(mean_sq)                    # _layer_norm (reuses previous ssq)
            h = jnp.dot(zn.astype(w.dtype), w,            # bf16 MXU, f32 accumulation
                        preferred_element_type=jnp.float32) + b
            a = jnp.maximum(h, 0.0)                       # ReLU_full_grad.forward
            # one sum-of-squares per layer, reused for BOTH the FF logit and the next norm
            ssq = jnp.sum(a * a, axis=-1, keepdims=True)  # padded lanes are exactly 0
            logit_cols.append(ssq - d_true)               # _calc_ff_loss logits
            mean_sq = ssq * (1.0 / d_true)                # mean(a^2) with the TRUE divisor
            z = a                                         # .detach() is a no-op in forward

        # Downstream classifier on the layer-normed last activation.  cls weights / bias
        # are zero beyond lane 9, so the matmul directly yields the packed 128-lane slab
        # (zeros elsewhere); FF logits are then placed in lanes 10..10+L-1 and the whole
        # slab is written with a single lane-dense store (one output DMA per tile).
        zn = z * _inv_rms(mean_sq)
        slab = jnp.dot(zn.astype(cls_w_ref.dtype), cls_w_ref[...],
                       preferred_element_type=jnp.float32) + cls_b_ref[...]
        lane = jax.lax.broadcasted_iota(jnp.int32, (tile_n, _OUT_PAD), 1)
        for l, col in enumerate(logit_cols):              # L select passes; L is small (2-3)
            slab = jnp.where(lane == _NUM_CLASSES + l, col, slab)
        out_ref[...] = slab

    return kernel


# ---------------------------------------------------------------------------
# Tiling / VMEM budgeting
# ---------------------------------------------------------------------------
def _choose_tiling(n, d_in, d_hidden_pad, weight_bytes):
    """Pick a row tile that fits the VMEM budget; pad n up to a multiple of it."""
    # bytes per row: double-buffered input + packed-output tiles, plus live f32/bf16
    # intermediates (zn, h/a, slab) that may spill from vregs to VMEM.
    per_row = (2 * d_in + 2 * _OUT_PAD) * 4 + 6 * d_in + 10 * d_hidden_pad + 8 * _OUT_PAD
    avail = max(_VMEM_BUDGET - 2 * weight_bytes, 0)
    cap = max(8, (min(1024, avail // per_row) // 8) * 8)
    n8 = _round_up(n, 8)
    tile = min(cap, n8)
    # Guarantee >= 2 row tiles when possible so dimension_semantics=("parallel",)
    # actually shards across v7x's 2 TensorCores.
    if n8 // tile < 2 and n8 >= 16:
        tile = max(8, ((n8 // 2) // 8) * 8)
    return tile, _round_up(n, tile)


def fused_frame_forward(z, layer_params, cls_w, cls_b, true_hidden):
    """z: (N, D_in) f32.  Returns packed (N_pad, 128) f32:
       lanes [0:10] classifier logits, lanes [10:10+num_layers] per-layer FF logits."""
    n, d_in = z.shape
    num_layers = len(layer_params)

    weight_bytes = int(cls_w.size) * cls_w.dtype.itemsize + int(cls_b.size) * cls_b.dtype.itemsize
    d_hidden_pad = _OUT_PAD
    for (w, b) in layer_params:
        weight_bytes += int(w.size) * w.dtype.itemsize + int(b.size) * b.dtype.itemsize
        d_hidden_pad = max(d_hidden_pad, w.shape[1])

    tile_n, n_pad = _choose_tiling(n, d_in, d_hidden_pad, weight_bytes)
    if n_pad != n:
        z = jnp.pad(z, ((0, n_pad - n), (0, 0)))   # zero rows: harmless, sliced off by caller

    in_specs = [pl.BlockSpec((tile_n, d_in), lambda i: (i, 0))]
    operands = [z]
    for (w, b) in layer_params:
        # constant index_map -> fetched once, stays VMEM-resident across all row tiles
        in_specs.append(pl.BlockSpec(w.shape, lambda i: (0, 0)))
        in_specs.append(pl.BlockSpec(b.shape, lambda i: (0, 0)))
        operands += [w, b]
    in_specs.append(pl.BlockSpec(cls_w.shape, lambda i: (0, 0)))
    in_specs.append(pl.BlockSpec(cls_b.shape, lambda i: (0, 0)))
    operands += [cls_w, cls_b]

    # Explicit scoped-VMEM declaration (never below the v6e/v7x default, never above 48 MiB).
    need = (2 * weight_bytes
            + 2 * tile_n * (d_in + _OUT_PAD) * 4
            + tile_n * (6 * d_in + 10 * d_hidden_pad + 8 * _OUT_PAD))
    vmem_limit = int(min(48 << 20, max(32 << 20, need + (2 << 20))))

    return pl.pallas_call(
        _make_fused_kernel(num_layers, true_hidden),
        grid=(n_pad // tile_n,),
        in_specs=in_specs,
        out_specs=pl.BlockSpec((tile_n, _OUT_PAD), lambda i: (i, 0)),
        out_shape=jax.ShapeDtypeStruct((n_pad, _OUT_PAD), jnp.float32),
        compiler_params=pltpu.CompilerParams(
            dimension_semantics=("parallel",),   # row tiles shard across TCs on v7x
            vmem_limit_bytes=vmem_limit),
    )(*operands)


# ---------------------------------------------------------------------------
# Loss glue (tiny scalars, plain JAX)
# ---------------------------------------------------------------------------
def bce_with_logits(logits, targets):
    # torch.nn.BCEWithLogitsLoss (mean reduction)
    return jnp.mean(
        jnp.maximum(logits, 0.0) - logits * targets + jnp.log1p(jnp.exp(-jnp.abs(logits)))
    )


def cross_entropy(logits, labels):
    # torch.nn.CrossEntropyLoss (mean reduction)
    lse = jax.scipy.special.logsumexp(logits, axis=-1)
    picked = jnp.take_along_axis(logits, labels[:, None], axis=-1)[:, 0]
    return jnp.mean(lse - picked)


# ---------------------------------------------------------------------------
# Model forward (unsupervised forward-forward path of Model.forward)
# ---------------------------------------------------------------------------
@partial(jax.jit, static_argnames=("batch_size", "hidden_dim"))
def model_forward(params, pos_images, neg_images, class_labels, batch_size, hidden_dim):
    z_all = jnp.concatenate([pos_images, neg_images], axis=0)       # (N, C, H, W)
    n_total = z_all.shape[0]
    posneg_labels = jnp.zeros((n_total,), jnp.float32).at[:batch_size].set(1.0)

    z_all = z_all.reshape(n_total, 1, -1)                            # unsqueeze(1) + flatten
    num_frames = z_all.shape[1]
    num_layers = len(params["layers"])

    loss = jnp.zeros((1,), jnp.float32)
    classification_loss = jnp.zeros((1,), jnp.float32)
    cum_output = jnp.zeros((batch_size, _NUM_CLASSES), jnp.float32)

    for f in range(num_frames):
        z = z_all[:, f]
        # one fused kernel launch per frame: all FF layers + downstream classifier
        packed = fused_frame_forward(
            z, params["layers"], params["cls_w"], params["cls_b"], hidden_dim)
        ff_logits = packed[:n_total, _NUM_CLASSES:_NUM_CLASSES + num_layers]
        output = packed[:batch_size, :_NUM_CLASSES]                  # positive samples only

        for l in range(num_layers):                                  # _calc_ff_loss per layer
            loss = loss + bce_with_logits(ff_logits[:, l], posneg_labels) / num_frames

        c_loss = cross_entropy(output, class_labels) / num_frames
        loss = loss + c_loss
        classification_loss = classification_loss + c_loss
        cum_output = cum_output + output

    accuracy = jnp.mean(
        (jnp.argmax(cum_output, axis=-1) == class_labels).astype(jnp.float32))
    return {
        "Loss": loss,
        "classification_loss": classification_loss,
        "classification_accuracy": accuracy,
    }


# ---------------------------------------------------------------------------
# Deterministic parameter init (mirrors Model._init_weights), lane-padded to 128
# ---------------------------------------------------------------------------
def init_params(key, input_size, hidden_dim, num_layers):
    d_hid_pad = _round_up(hidden_dim, 128)
    sizes_t = [input_size] + [hidden_dim] * num_layers     # true feature widths
    sizes_p = [input_size] + [d_hid_pad] * num_layers      # lane-padded widths
    layers = []
    for i in range(num_layers):
        key, sub = jax.random.split(key)
        d_in_t, d_out_t = sizes_t[i], sizes_t[i + 1]
        d_in_p, d_out_p = sizes_p[i], sizes_p[i + 1]
        # torch: normal_(mean=0, std=1/sqrt(out_features)); stored transposed (Din, Dout),
        # zero-padded to full 128-lane width (padded columns/rows contribute nothing).
        w_t = jax.random.normal(sub, (d_in_t, d_out_t), jnp.float32) / math.sqrt(d_out_t)
        w = jnp.zeros((d_in_p, d_out_p), jnp.float32).at[:d_in_t, :d_out_t].set(w_t)
        b = jnp.zeros((1, d_out_p), jnp.float32)
        layers.append((w.astype(_MATMUL_DTYPE), b))
    # linear_classifier: weight zero-initialized, bias keeps torch's default uniform init.
    key, sub = jax.random.split(key)
    bound = 1.0 / math.sqrt(hidden_dim)
    cls_b_t = jax.random.uniform(sub, (_NUM_CLASSES,), jnp.float32, minval=-bound, maxval=bound)
    cls_w = jnp.zeros((sizes_p[-1], _OUT_PAD), _MATMUL_DTYPE)
    cls_b = jnp.zeros((1, _OUT_PAD), jnp.float32).at[0, :_NUM_CLASSES].set(cls_b_t)
    return {"layers": layers, "cls_w": cls_w, "cls_b": cls_b}


# ---------------------------------------------------------------------------
if __name__ == "__main__":
    # small shapes: batch=2, channels=1, spatial=16x16 -> input_layer_size=256,
    # hidden_dim=32, num_layers=2, 10 classes
    batch_size, C, H, W = 2, 1, 16, 16
    hidden_dim, num_layers = 32, 2
    input_size = C * H * W

    key = jax.random.PRNGKey(0)
    k_pos, k_neg, k_lab, k_par = jax.random.split(key, 4)

    pos_images = jax.random.normal(k_pos, (batch_size, C, H, W), jnp.float32)
    neg_images = jax.random.normal(k_neg, (batch_size, C, H, W), jnp.float32)
    class_labels = jax.random.randint(k_lab, (batch_size,), 0, 10)

    params = init_params(k_par, input_size, hidden_dim, num_layers)

    outputs = model_forward(params, pos_images, neg_images, class_labels,
                            batch_size, hidden_dim)
    outputs = jax.tree_util.tree_map(jax.block_until_ready, outputs)
    print("KERNEL_OK")
</pallas_src>

<mosaic_0001>
module attributes {stable_mosaic.version = 11 : i64} {
  func.func @kernel(%arg0: i32, %arg1: memref<8x256xf32, #tpu.memory_space<vmem>>, %arg2: memref<256x128xbf16, #tpu.memory_space<vmem>>, %arg3: memref<1x128xf32, #tpu.memory_space<vmem>>, %arg4: memref<128x128xbf16, #tpu.memory_space<vmem>>, %arg5: memref<1x128xf32, #tpu.memory_space<vmem>>, %arg6: memref<128x128xbf16, #tpu.memory_space<vmem>>, %arg7: memref<1x128xf32, #tpu.memory_space<vmem>>, %arg8: memref<8x128xf32, #tpu.memory_space<vmem>>) attributes {dimension_semantics = [#tpu.dimension_semantics<parallel>], iteration_bounds = array<i64: 1>, scalar_prefetch = 0 : i64, scratch_operands = 0 : i64, tpu.core_type = #tpu.core_type<tc>, window_params = [{transform_indices = @transform_0, window_bounds = array<i64: 8, 256>}, {pipeline_mode = #tpu.pipeline_mode<synchronous>, transform_indices = @transform_1, window_bounds = array<i64: 256, 128>}, {pipeline_mode = #tpu.pipeline_mode<synchronous>, transform_indices = @transform_2, window_bounds = array<i64: 1, 128>}, {pipeline_mode = #tpu.pipeline_mode<synchronous>, transform_indices = @transform_3, window_bounds = array<i64: 128, 128>}, {pipeline_mode = #tpu.pipeline_mode<synchronous>, transform_indices = @transform_4, window_bounds = array<i64: 1, 128>}, {pipeline_mode = #tpu.pipeline_mode<synchronous>, transform_indices = @transform_5, window_bounds = array<i64: 128, 128>}, {pipeline_mode = #tpu.pipeline_mode<synchronous>, transform_indices = @transform_6, window_bounds = array<i64: 1, 128>}, {transform_indices = @transform_7, window_bounds = array<i64: 8, 128>}]} {
    %c0 = arith.constant 0 : index
    %c0_0 = arith.constant 0 : index
    %0 = vector.load %arg1[%c0, %c0_0] : memref<8x256xf32, #tpu.memory_space<vmem>>, vector<8x256xf32>
    %1 = arith.mulf %0, %0 : vector<8x256xf32>
    %cst = arith.constant dense<0.000000e+00> : vector<8xf32>
    %2 = vector.multi_reduction <add>, %1, %cst [1] : vector<8x256xf32> to vector<8xf32>
    %3 = vector.shape_cast %2 : vector<8xf32> to vector<8x1xf32>
    %cst_1 = arith.constant 2.560000e+02 : f32
    %4 = vector.broadcast %cst_1 : f32 to vector<8x1xf32>
    %5 = arith.divf %3, %4 : vector<8x1xf32>
    %c0_2 = arith.constant 0 : index
    %c0_3 = arith.constant 0 : index
    %6 = vector.load %arg2[%c0_2, %c0_3] : memref<256x128xbf16, #tpu.memory_space<vmem>>, vector<256x128xbf16>
    %c0_4 = arith.constant 0 : index
    %c0_5 = arith.constant 0 : index
    %7 = vector.load %arg3[%c0_4, %c0_5] : memref<1x128xf32, #tpu.memory_space<vmem>>, vector<1x128xf32>
    %8 = math.sqrt %5 : vector<8x1xf32>
    %cst_6 = arith.constant 9.99999993E-9 : f32
    %9 = vector.broadcast %cst_6 : f32 to vector<8x1xf32>
    %10 = arith.addf %8, %9 : vector<8x1xf32>
    %11 = tpu.reciprocal %10 {approx = true} : vector<8x1xf32> -> vector<8x1xf32>
    %12 = vector.broadcast %11 : vector<8x1xf32> to vector<8x256xf32>
    %13 = arith.mulf %0, %12 : vector<8x256xf32>
    %14 = arith.truncf %13 : vector<8x256xf32> to vector<8x256xbf16>
    %cst_7 = arith.constant dense<0.000000e+00> : vector<8x128xf32>
    %15 = tpu.matmul %14, %6, %cst_7 {dimension_numbers = #tpu.dot_dimension_numbers<[1], [0], [0], [1], [0, 0, 1, 1], [], []>} : vector<8x256xbf16>, vector<256x128xbf16>, vector<8x128xf32> -> vector<8x128xf32>
    %16 = vector.broadcast %7 : vector<1x128xf32> to vector<8x128xf32>
    %17 = arith.addf %15, %16 : vector<8x128xf32>
    %cst_8 = arith.constant 0.000000e+00 : f32
    %18 = vector.broadcast %cst_8 : f32 to vector<8x128xf32>
    %19 = arith.maximumf %17, %18 : vector<8x128xf32>
    %20 = arith.mulf %19, %19 : vector<8x128xf32>
    %cst_9 = arith.constant dense<0.000000e+00> : vector<8xf32>
    %21 = vector.multi_reduction <add>, %20, %cst_9 [1] : vector<8x128xf32> to vector<8xf32>
    %22 = vector.shape_cast %21 : vector<8xf32> to vector<8x1xf32>
    %cst_10 = arith.constant 3.200000e+01 : f32
    %23 = vector.broadcast %cst_10 : f32 to vector<8x1xf32>
    %24 = arith.subf %22, %23 : vector<8x1xf32>
    %cst_11 = arith.constant 3.125000e-02 : f32
    %25 = vector.broadcast %cst_11 : f32 to vector<8x1xf32>
    %26 = arith.mulf %22, %25 : vector<8x1xf32>
    %c0_12 = arith.constant 0 : index
    %c0_13 = arith.constant 0 : index
    %27 = vector.load %arg4[%c0_12, %c0_13] : memref<128x128xbf16, #tpu.memory_space<vmem>>, vector<128x128xbf16>
    %c0_14 = arith.constant 0 : index
    %c0_15 = arith.constant 0 : index
    %28 = vector.load %arg5[%c0_14, %c0_15] : memref<1x128xf32, #tpu.memory_space<vmem>>, vector<1x128xf32>
    %29 = math.sqrt %26 : vector<8x1xf32>
    %cst_16 = arith.constant 9.99999993E-9 : f32
    %30 = vector.broadcast %cst_16 : f32 to vector<8x1xf32>
    %31 = arith.addf %29, %30 : vector<8x1xf32>
    %32 = tpu.reciprocal %31 {approx = true} : vector<8x1xf32> -> vector<8x1xf32>
    %33 = vector.broadcast %32 : vector<8x1xf32> to vector<8x128xf32>
    %34 = arith.mulf %19, %33 : vector<8x128xf32>
    %35 = arith.truncf %34 : vector<8x128xf32> to vector<8x128xbf16>
    %cst_17 = arith.constant dense<0.000000e+00> : vector<8x128xf32>
    %36 = tpu.matmul %35, %27, %cst_17 {dimension_numbers = #tpu.dot_dimension_numbers<[1], [0], [0], [1], [0, 0, 1, 1], [], []>} : vector<8x128xbf16>, vector<128x128xbf16>, vector<8x128xf32> -> vector<8x128xf32>
    %37 = vector.broadcast %28 : vector<1x128xf32> to vector<8x128xf32>
    %38 = arith.addf %36, %37 : vector<8x128xf32>
    %cst_18 = arith.constant 0.000000e+00 : f32
    %39 = vector.broadcast %cst_18 : f32 to vector<8x128xf32>
    %40 = arith.maximumf %38, %39 : vector<8x128xf32>
    %41 = arith.mulf %40, %40 : vector<8x128xf32>
    %cst_19 = arith.constant dense<0.000000e+00> : vector<8xf32>
    %42 = vector.multi_reduction <add>, %41, %cst_19 [1] : vector<8x128xf32> to vector<8xf32>
    %43 = vector.shape_cast %42 : vector<8xf32> to vector<8x1xf32>
    %cst_20 = arith.constant 3.200000e+01 : f32
    %44 = vector.broadcast %cst_20 : f32 to vector<8x1xf32>
    %45 = arith.subf %43, %44 : vector<8x1xf32>
    %cst_21 = arith.constant 3.125000e-02 : f32
    %46 = vector.broadcast %cst_21 : f32 to vector<8x1xf32>
    %47 = arith.mulf %43, %46 : vector<8x1xf32>
    %48 = math.sqrt %47 : vector<8x1xf32>
    %cst_22 = arith.constant 9.99999993E-9 : f32
    %49 = vector.broadcast %cst_22 : f32 to vector<8x1xf32>
    %50 = arith.addf %48, %49 : vector<8x1xf32>
    %51 = tpu.reciprocal %50 {approx = true} : vector<8x1xf32> -> vector<8x1xf32>
    %52 = vector.broadcast %51 : vector<8x1xf32> to vector<8x128xf32>
    %53 = arith.mulf %40, %52 : vector<8x128xf32>
    %54 = arith.truncf %53 : vector<8x128xf32> to vector<8x128xbf16>
    %c0_23 = arith.constant 0 : index
    %c0_24 = arith.constant 0 : index
    %55 = vector.load %arg6[%c0_23, %c0_24] : memref<128x128xbf16, #tpu.memory_space<vmem>>, vector<128x128xbf16>
    %cst_25 = arith.constant dense<0.000000e+00> : vector<8x128xf32>
    %56 = tpu.matmul %54, %55, %cst_25 {dimension_numbers = #tpu.dot_dimension_numbers<[1], [0], [0], [1], [0, 0, 1, 1], [], []>} : vector<8x128xbf16>, vector<128x128xbf16>, vector<8x128xf32> -> vector<8x128xf32>
    %c0_26 = arith.constant 0 : index
    %c0_27 = arith.constant 0 : index
    %57 = vector.load %arg7[%c0_26, %c0_27] : memref<1x128xf32, #tpu.memory_space<vmem>>, vector<1x128xf32>
    %58 = vector.broadcast %57 : vector<1x128xf32> to vector<8x128xf32>
    %59 = arith.addf %56, %58 : vector<8x128xf32>
    %60 = tpu.iota {dimensions = array<i32: 1>} : vector<8x128xi32>
    %c10_i32 = arith.constant 10 : i32
    %61 = vector.broadcast %c10_i32 : i32 to vector<8x128xi32>
    %62 = arith.cmpi eq, %60, %61 : vector<8x128xi32>
    %63 = vector.shape_cast %24 : vector<8x1xf32> to vector<8x1xf32>
    %64 = vector.broadcast %63 : vector<8x1xf32> to vector<8x128xf32>
    %65 = arith.select %62, %64, %59 : vector<8x128xi1>, vector<8x128xf32>
    %c11_i32 = arith.constant 11 : i32
    %66 = vector.broadcast %c11_i32 : i32 to vector<8x128xi32>
    %67 = arith.cmpi eq, %60, %66 : vector<8x128xi32>
    %68 = vector.shape_cast %45 : vector<8x1xf32> to vector<8x1xf32>
    %69 = vector.broadcast %68 : vector<8x1xf32> to vector<8x128xf32>
    %70 = arith.select %67, %69, %65 : vector<8x128xi1>, vector<8x128xf32>
    %c0_28 = arith.constant 0 : index
    %c0_29 = arith.constant 0 : index
    %71 = vector.load %arg8[%c0_28, %c0_29] : memref<8x128xf32, #tpu.memory_space<vmem>>, vector<8x128xf32>
    tpu.vector_store %arg8[%c0_28, %c0_29], %70 {strides = array<i32>} : memref<8x128xf32, #tpu.memory_space<vmem>>, vector<8x128xf32>,
    return
  }
  func.func @transform_0(%arg0: i32) -> (i32, i32) {
    %c0_i32 = arith.constant 0 : i32
    %c0_i32_0 = arith.constant 0 : i32
    return %arg0, %c0_i32 : i32, i32
  }
  func.func @transform_1(%arg0: i32) -> (i32, i32) {
    %c0_i32 = arith.constant 0 : i32
    %c0_i32_0 = arith.constant 0 : i32
    %c0_i32_1 = arith.constant 0 : i32
    return %c0_i32, %c0_i32_0 : i32, i32
  }
  func.func @transform_2(%arg0: i32) -> (i32, i32) {
    %c0_i32 = arith.constant 0 : i32
    %c0_i32_0 = arith.constant 0 : i32
    %c0_i32_1 = arith.constant 0 : i32
    return %c0_i32, %c0_i32_0 : i32, i32
  }
  func.func @transform_3(%arg0: i32) -> (i32, i32) {
    %c0_i32 = arith.constant 0 : i32
    %c0_i32_0 = arith.constant 0 : i32
    %c0_i32_1 = arith.constant 0 : i32
    return %c0_i32, %c0_i32_0 : i32, i32
  }
  func.func @transform_4(%arg0: i32) -> (i32, i32) {
    %c0_i32 = arith.constant 0 : i32
    %c0_i32_0 = arith.constant 0 : i32
    %c0_i32_1 = arith.constant 0 : i32
    return %c0_i32, %c0_i32_0 : i32, i32
  }
  func.func @transform_5(%arg0: i32) -> (i32, i32) {
    %c0_i32 = arith.constant 0 : i32
    %c0_i32_0 = arith.constant 0 : i32
    %c0_i32_1 = arith.constant 0 : i32
    return %c0_i32, %c0_i32_0 : i32, i32
  }
  func.func @transform_6(%arg0: i32) -> (i32, i32) {
    %c0_i32 = arith.constant 0 : i32
    %c0_i32_0 = arith.constant 0 : i32
    %c0_i32_1 = arith.constant 0 : i32
    return %c0_i32, %c0_i32_0 : i32, i32
  }
  func.func @transform_7(%arg0: i32) -> (i32, i32) {
    %c0_i32 = arith.constant 0 : i32
    %c0_i32_0 = arith.constant 0 : i32
    return %arg0, %c0_i32 : i32, i32
  }
}

</mosaic_0001>

<bundles_post_ra>
// kernel: model_forward.1
= control target key start
LH: loop header
LB: loop body
LE: loop exit
PB: predicated region body
PF: predicated region fallthrough
CT: control target
= control target key end

     0   :  { %12 = vsyncpa [#allocation3], 0  ;;  %s694_s24 = smov [#allocation2]   ;;  %s854_s0 = inlined_call_operand.vmem [shape: f32[8,256], index: 0, kind: input, shape index: {}]   ;;  %s855_s1 = inlined_call_operand.vmem [shape: bf16[256,128], index: 1, kind: input, shape index: {}]   ;;  %s856_s2 = inlined_call_operand.vmem [shape: f32[1,128], index: 2, kind: input, shape index: {}]   ;;  %s857_s3 = inlined_call_operand.vmem [shape: bf16[128,128], index: 3, kind: input, shape index: {}]   ;;  %s858_s4 = inlined_call_operand.vmem [shape: f32[1,128], index: 4, kind: input, shape index: {}]   ;;  %s859_s5 = inlined_call_operand.hbm [shape: bf16[128,128], index: 5, kind: input, shape index: {}]   ;;  %s860_s6 = inlined_call_operand.vmem [shape: f32[1,128], index: 6, kind: input, shape index: {}]   ;;  %s861_s7 = inlined_call_operand.vmem [shape: f32[8,128], index: 7, kind: output, shape index: {}]  }
   0x1   :  { %s28_s25 = sshll.u32 %s694_s24, 4  ;;  %s29_s25 = int_to_ptr.vmem [resolvable:$true] %s28_s25 }
   0x2   :  { %s680_s26 = scalar_lea.vmem %s29_s25, 1024  ;;  %p685_p1 = scmp.lt.s32.totalorder %s29_s25, %s29_s25 }
   0x3   :  { %p681_p0 = scmp.ne.s32.totalorder %s29_s25, %s680_s26  ;;  %p686_p2 = scmp.lt.s32.totalorder %s680_s26, %s680_s26 }
   0x5   :  { %p687_p3 = por %p686_p2, %p685_p1 }
   0x7   :  { %p688_p4 = pnand %p687_p3, %p681_p0 }
   0x9   :  { %691 = shalt.err (!%p688_p4)
}
   0xa   :  { %s695_s27 = smov 64   ;;  %s696_s28 = smov 4  }
   0xb   :  { %34 = dma.hbm_to_vmem [thread:$0]  %s859_s5, 1024, %s29_s25, [#allocation3], %s695_s27, %s695_s27, %s696_s28  }
   0xc   :  { %692 = dma.done.wait [#allocation3], 1024  }
   0xd   :  { %693 = vsyncadd [#allocation3], 4294966272  ;;  %v41_v0 = vld [vmem:[%s854_s0] sm:$0xff]  ;;  %v42_v1 = vld [vmem:[%s854_s0 + $0x8] sm:$0xff]  ;;  %v697_v44 = vmov 0.0   ;;  %vm698_vm2 = vmmov 0  }
   0xe   :  { %v43_v2 = vmul.f32 %v41_v0, %v41_v0  ;;  %v44_v3 = vmul.f32 %v42_v1, %v42_v1  ;;  %v628_v5 = vld [vmem:[%s855_s1 + $0x78] sm:$0xff]   ;;  %v630_v7 = vld [vmem:[%s855_s1 + $0x70] sm:$0xff]   ;;  %v632_v9 = vld [vmem:[%s855_s1 + $0x68] sm:$0xff]   ;;  %583 = vmatprep.subr.bf16.mxu1 %v697_v44  ;;  %599 = vmatprep.mubr.msk.bf16.mxu1 %vm698_vm2, %v697_v44 }
   0xf   :  { %v629_v6 = vld [vmem:[%s855_s1 + $0x38] sm:$0xff]   ;;  %543 = vmatprep.subr.bf16.mxu0 %v628_v5  ;;  %v631_v8 = vld [vmem:[%s855_s1 + $0x30] sm:$0xff]   ;;  %v633_v10 = vld [vmem:[%s855_s1 + $0x28] sm:$0xff]  }
  0x10   :  { %v45_v4 = vadd.f32 %v44_v3, %v43_v2  ;;  %544 = vmatpush3.bf16.msra.mxu0 %v629_v6  ;;  %v634_v11 = vld [vmem:[%s855_s1 + $0x60] sm:$0xff]   ;;  %v636_v13 = vld [vmem:[%s855_s1 + $0x58] sm:$0xff]   ;;  %v638_v15 = vld [vmem:[%s855_s1 + $0x50] sm:$0xff]  }
  0x11   :  { %545 = vmatprep.subr.bf16.mxu0 %v630_v7  ;;  %v635_v12 = vld [vmem:[%s855_s1 + $0x20] sm:$0xff]   ;;  %v637_v14 = vld [vmem:[%s855_s1 + $0x18] sm:$0xff]   ;;  %v639_v16 = vld [vmem:[%s855_s1 + $0x10] sm:$0xff]  }
  0x12   :  { %46 = vadd.xlane.f32.xlu0 %v45_v4  ;;  %v640_v17 = vld [vmem:[%s855_s1 + $0x48] sm:$0xff]   ;;  %v642_v19 = vld [vmem:[%s855_s1 + $0x40] sm:$0xff]   ;;  %v644_v43 = vld [vmem:[%s857_s3 + $0x38] sm:$0xff]  }
  0x13   :  { %v641_v18 = vld [vmem:[%s855_s1 + $0x8] sm:$0xff]   ;;  %v643_v20 = vld [vmem:[%s855_s1] sm:$0xff]   ;;  %584 = vmatpush3.bf16.msra.mxu1 %v644_v43  ;;  %v645_v45 = vld [vmem:[%s857_s3 + $0x30] sm:$0xff]  }
  0x14   :  { %546 = vmatpush3.bf16.msra.mxu0 %v631_v8  ;;  %v506_v35 = vld [vmem:[%s856_s2] ss:$0 sm:$0xff]  ;;  %585 = vmatprep.subr.bf16.mxu1 %v697_v44  ;;  %v646_v46 = vld [vmem:[%s857_s3 + $0x28] sm:$0xff]   ;;  %v648_v48 = vld [vmem:[%s857_s3 + $0x18] sm:$0xff]  }
  0x15   :  { %547 = vmatprep.subr.bf16.mxu0 %v632_v9  ;;  %v647_v47 = vld [vmem:[%s857_s3 + $0x20] sm:$0xff]   ;;  %v649_v49 = vld [vmem:[%s857_s3 + $0x10] sm:$0xff]   ;;  %v650_v50 = vld [vmem:[%s857_s3 + $0x8] sm:$0xff]  }
  0x16   :  { %v651_v51 = vld [vmem:[%s857_s3] sm:$0xff]   ;;  %v652_v7 = vld [vmem:[#allocation2 + $0x38] sm:$0xff]   ;;  %v653_v8 = vld [vmem:[#allocation2 + $0x30] sm:$0xff]  }
  0x17   :  { %586 = vmatpush3.bf16.msra.mxu1 %v645_v45  ;;  %v524_v63 = vld [vmem:[%s858_s4] ss:$0 sm:$0xff]  ;;  %v654_v9 = vld [vmem:[#allocation2 + $0x28] sm:$0xff]  }
  0x18   :  { %548 = vmatpush3.bf16.msra.mxu0 %v633_v10  ;;  %587 = vmatprep.subr.bf16.mxu1 %v697_v44  ;;  %v655_v10 = vld [vmem:[#allocation2 + $0x20] sm:$0xff]  }
  0x19   :  { %549 = vmatprep.subr.bf16.mxu0 %v634_v11  ;;  %v656_v11 = vld [vmem:[#allocation2 + $0x18] sm:$0xff]  }
  0x1b   :  { %588 = vmatpush3.bf16.msra.mxu1 %v646_v46 }
  0x1c   :  { %550 = vmatpush3.bf16.msra.mxu0 %v635_v12  ;;  %589 = vmatprep.subr.bf16.mxu1 %v697_v44  ;;  %v657_v12 = vld [vmem:[#allocation2 + $0x10] sm:$0xff]  }
  0x1d   :  { %551 = vmatprep.subr.bf16.mxu0 %v636_v13  ;;  %v658_v13 = vld [vmem:[#allocation2 + $0x8] sm:$0xff]  }
  0x1f   :  { %590 = vmatpush3.bf16.msra.mxu1 %v647_v47 }
  0x20   :  { %552 = vmatpush3.bf16.msra.mxu0 %v637_v14  ;;  %591 = vmatprep.subr.bf16.mxu1 %v697_v44  ;;  %v659_v14 = vld [vmem:[#allocation2] sm:$0xff]  }
  0x21   :  { %553 = vmatprep.subr.bf16.mxu0 %v638_v15 }
  0x23   :  { %592 = vmatpush3.bf16.msra.mxu1 %v648_v48 }
  0x24   :  { %554 = vmatpush3.bf16.msra.mxu0 %v639_v16  ;;  %593 = vmatprep.subr.bf16.mxu1 %v697_v44 }
  0x25   :  { %555 = vmatprep.subr.bf16.mxu0 %v640_v17 }
  0x27   :  { %594 = vmatpush3.bf16.msra.mxu1 %v649_v49 }
  0x28   :  { %556 = vmatpush3.bf16.msra.mxu0 %v641_v18  ;;  %595 = vmatprep.subr.bf16.mxu1 %v697_v44 }
  0x29   :  { %557 = vmatprep.subr.bf16.mxu0 %v642_v19 }
  0x2b   :  { %596 = vmatpush3.bf16.msra.mxu1 %v650_v50 }
  0x2c   :  { %558 = vmatpush3.bf16.msra.mxu0 %v643_v20  ;;  %597 = vmatprep.subr.bf16.mxu1 %v697_v44 }
  0x2d   :  { %603 = vmatprep.subr.bf16.mxu0 %v697_v44 }
  0x2f   :  { %598 = vmatpush3.bf16.msra.mxu1 %v651_v51 }
  0x9b   :  { %v47_v21 = vpop.xlane.xlu0 %46 }
  0x9c   :  { %v49_v22 = vmul.f32 0.00390625, %v47_v21 }
  0x9e   :  { %660 = vrsqrt.f32 %v49_v22  ;;  %vm85_vm0 = vcmp.eq.f32.partialorder %v49_v22, inf  ;;  %v88_v25 = vand.u32 2147483648, %v49_v22  ;;  %vm87_vm1 = vcmp.eq.f32.partialorder %v49_v22, 0.0 }
  0xab   :  { %v661_v23 = vpop.eup %660 }
  0xac   :  { %v84_v24 = vmul.f32 %v661_v23, %v49_v22 }
  0xae   :  { %v86_v26 = vsel %vm85_vm0, %v49_v22, %v84_v24 }
  0xaf   :  { %v89_v27 = vsel %vm87_vm1, %v88_v25, %v86_v26  ;;  %v494_v26 = vlaneseq }
  0xb0   :  { %v90_v28 = vadd.f32 1e-08, %v89_v27 }
  0xb1   :  { %v495_v27 = vand.u32 127, %v494_v26 }
  0xb2   :  { %662 = vrcp.f32 %v90_v28  ;;  %v534_v28 = vld [vmem:[%s860_s6] ss:$0 sm:$0xff] }
  0xb3   :  { %vm496_vm7 = vcmp.eq.s32.totalorder %v495_v27, 10  ;;  %vm498_vm8 = vcmp.eq.s32.totalorder %v495_v27, 11 }
  0xbf   :  { %v663_v29 = vpop.eup %662 }
  0xc0   :  { %v93_v30 = vmul.f32 %v663_v29, %v42_v1  ;;  %v92_v31 = vmul.f32 %v663_v29, %v41_v0 }
  0xc2   :  { %v95_v32 = vpack.c.bf16 %v93_v30, %v93_v30  ;;  %v94_v33 = vpack.c.bf16 %v92_v31, %v92_v31 }
  0xc4   :  { %230 = vmatprep.mubr.bf16.mxu0 %v95_v32 }
  0xc5   :  { %231 = vmatmul.mubr.bf16.vlgmr.msra.gmra.mxu0 %v94_v33 }
  0xc6   :  { %619 = vmatprep.mubr.msk.bf16.mxu0 %vm698_vm2, %v697_v44  ;;  %604 = vmatpush3.bf16.msra.mxu0 %v652_v7 }
  0xc7   :  { %605 = vmatprep.subr.bf16.mxu0 %v697_v44 }
  0xca   :  { %606 = vmatpush3.bf16.msra.mxu0 %v653_v8 }
  0xcb   :  { %607 = vmatprep.subr.bf16.mxu0 %v697_v44 }
  0xce   :  { %608 = vmatpush3.bf16.msra.mxu0 %v654_v9 }
  0xcf   :  { %609 = vmatprep.subr.bf16.mxu0 %v697_v44 }
  0xd2   :  { %610 = vmatpush3.bf16.msra.mxu0 %v655_v10 }
  0xd3   :  { %611 = vmatprep.subr.bf16.mxu0 %v697_v44 }
  0xd6   :  { %612 = vmatpush3.bf16.msra.mxu0 %v656_v11 }
  0xd7   :  { %613 = vmatprep.subr.bf16.mxu0 %v697_v44 }
  0xda   :  { %614 = vmatpush3.bf16.msra.mxu0 %v657_v12 }
  0xdb   :  { %615 = vmatprep.subr.bf16.mxu0 %v697_v44 }
  0xde   :  { %616 = vmatpush3.bf16.msra.mxu0 %v658_v13 }
  0xdf   :  { %617 = vmatprep.subr.bf16.mxu0 %v697_v44 }
  0xe2   :  { %618 = vmatpush3.bf16.msra.mxu0 %v659_v14 }
 0x185   :  { %v559_v34 = vpop.f32.mrf.mxu0 }
 0x187   :  { %v560_v36 = vpop.f32.mrf.mxu0 }
 0x188   :  { %v561_v37 = vadd.f32 %v560_v36, %v559_v34 }
 0x189   :  { %v562_v38 = vpop.f32.mrf.mxu0 }
 0x18a   :  { %v233_v39 = vadd.f32 %v561_v37, %v506_v35 }
 0x18b   :  { %v563_v40 = vpop.f32.mrf.mxu0 }
 0x18c   :  { %v238_v41 = vmax.f32 %v233_v39, 0.0 }
 0x18e   :  { %v239_v42 = vmul.f32 %v238_v41, %v238_v41 }
 0x190   :  { %240 = vadd.xlane.f32.xlu0 %v239_v42 }
 0x219   :  { %v834_v52 = vpop.xlane.xlu0 %240 }
 0x21a   :  { %v243_v53 = vmul.f32 0.03125, %v834_v52  ;;  %v523_v30 = vadd.f32 -32.0, %v834_v52 }
 0x21c   :  { %664 = vrsqrt.f32 %v243_v53  ;;  %vm263_vm3 = vcmp.eq.f32.partialorder %v243_v53, inf  ;;  %v266_v56 = vand.u32 2147483648, %v243_v53  ;;  %vm265_vm4 = vcmp.eq.f32.partialorder %v243_v53, 0.0 }
 0x229   :  { %v665_v54 = vpop.eup %664 }
 0x22a   :  { %v262_v55 = vmul.f32 %v665_v54, %v243_v53 }
 0x22c   :  { %v264_v57 = vsel %vm263_vm3, %v243_v53, %v262_v55 }
 0x22d   :  { %v267_v58 = vsel %vm265_vm4, %v266_v56, %v264_v57 }
 0x22e   :  { %v268_v59 = vadd.f32 1e-08, %v267_v58 }
 0x230   :  { %666 = vrcp.f32 %v268_v59 }
 0x23d   :  { %v667_v60 = vpop.eup %666 }
 0x23e   :  { %v270_v61 = vmul.f32 %v667_v60, %v238_v41 }
 0x240   :  { %v271_v62 = vpack.c.bf16 %v270_v61, %v270_v61 }
 0x242   :  { %600 = vmatmul.mubr.bf16.vlgmr.msra.gmra.mxu1 %v271_v62 }
 0x302   :  { %v360_v0 = vpop.f32.mrf.mxu1 }
 0x303   :  { %v361_v1 = vadd.f32 %v524_v63, %v360_v0 }
 0x304   :  { %v601_v2 = vpop.f32.mrf.mxu1 }
 0x305   :  { %v366_v3 = vmax.f32 %v361_v1, 0.0 }
 0x306   :  { %v363_v4 = vpop.f32.mrf.mxu1 }
 0x307   :  { %v367_v5 = vmul.f32 %v366_v3, %v366_v3 }
 0x308   :  { %v602_v6 = vpop.f32.mrf.mxu1 }
 0x309   :  { %368 = vadd.xlane.f32.xlu1 %v367_v5 }
 0x392   :  { %v369_v15 = vpop.xlane.xlu1 %368 }
 0x393   :  { %v371_v16 = vmul.f32 0.03125, %v369_v15  ;;  %v533_v32 = vadd.f32 -32.0, %v369_v15 }
 0x395   :  { %668 = vrsqrt.f32 %v371_v16  ;;  %vm374_vm5 = vcmp.eq.f32.partialorder %v371_v16, inf  ;;  %v377_v19 = vand.u32 2147483648, %v371_v16  ;;  %vm376_vm6 = vcmp.eq.f32.partialorder %v371_v16, 0.0 }
 0x3a2   :  { %v669_v17 = vpop.eup %668 }
 0x3a3   :  { %v373_v18 = vmul.f32 %v669_v17, %v371_v16 }
 0x3a5   :  { %v375_v20 = vsel %vm374_vm5, %v371_v16, %v373_v18 }
 0x3a6   :  { %v378_v21 = vsel %vm376_vm6, %v377_v19, %v375_v20 }
 0x3a7   :  { %v379_v22 = vadd.f32 1e-08, %v378_v21 }
 0x3a9   :  { %670 = vrcp.f32 %v379_v22 }
 0x3b6   :  { %v671_v23 = vpop.eup %670 }
 0x3b7   :  { %v381_v24 = vmul.f32 %v671_v23, %v366_v3 }
 0x3b9   :  { %v382_v25 = vpack.c.bf16 %v381_v24, %v381_v24 }
 0x3bb   :  { %620 = vmatmul.mubr.bf16.vlgmr.msra.gmra.mxu0 %v382_v25 }
 0x47b   :  { %v488_v29 = vpop.f32.mrf.mxu0 }
 0x47c   :  { %v489_v31 = vadd.f32 %v534_v28, %v488_v29 }
 0x47d   :  { %v621_v33 = vpop.f32.mrf.mxu0 }
 0x47e   :  { %v497_v34 = vsel %vm496_vm7, %v523_v30, %v489_v31 }
 0x47f   :  { %v499_v35 = vsel %vm498_vm8, %v533_v32, %v497_v34  ;;  %v491_v36 = vpop.f32.mrf.mxu0 }
 0x480   :  { %500 = vst [vmem:[%s861_s7] sm:$0xff] %v499_v35 }
 0x481   :  { %v622_v37 = vpop.f32.mrf.mxu0 }
 0x482   :  { %505 = vsyncpa [#allocation3], 1 }

</bundles_post_ra>
